<compile_context>
chip_gen: v6e
topology: v6e:2x2x1
jax: 0.10.0
libtpu: 0.0.40
codegen_flags: <defaults>
</compile_context>

<pallas_src>
import functools

import jax
import jax.numpy as jnp
from jax import lax
from jax.experimental import pallas as pl
from jax.experimental.pallas import tpu as pltpu


def _triple(v):
    if isinstance(v, (tuple, list)):
        assert len(v) == 3
        return tuple(int(e) for e in v)
    return (int(v),) * 3


def _recip(v):
    """Reciprocal = EUP approximate op + one Newton step (~f32 accurate).

    The refinement restores full accuracy (the bare approximation is only
    ~8-12 bits, which caused the previous 7e-3 mismatch) while keeping the
    bulk of the divide off the VALU slot.
    """
    r = pl.reciprocal(v, approx=True)
    return r * (2.0 - v * r)


def adapool_kernel(x_ref, beta_ref, o_ref):
    """x_ref: (K, TBC, TL) windows; beta_ref: (1, TL) f32; o_ref: (TBC, TL).

    The block is processed in `rows`-row chunks.  Each chunk runs two unrolled
    fori_loops over the K window elements so only ~6 (rows, TL) f32
    accumulators are live at once (no (K, TBC, TL) f32 temporaries -> no vreg
    spills), and sub-32-bit inputs are upcast one K-slice at a time.
    """
    K, TBC, TL = x_ref.shape
    pack = max(1, 4 // x_ref.dtype.itemsize)          # 1 f32 / 2 bf16 / 4 int8
    rows = 8 * pack                                    # aligned packed-tile slices
    if TBC % rows != 0:
        rows = 8 if TBC % 8 == 0 else TBC
    n_chunks = TBC // rows

    beta = beta_ref[...]                               # (1, TL) float32
    inv_k = jnp.float32(1.0 / K)
    tiny = jnp.float32(jnp.finfo(jnp.float32).tiny)

    def chunk(c, carry):
        r0 = pl.multiple_of(c * rows, rows)
        rs = pl.ds(r0, rows)

        # ---- pass 1: window max (softmax shift) and window mean ----
        def p1(k, mc):
            m, s = mc
            xk = x_ref[k, rs, :].astype(jnp.float32)
            return jnp.maximum(m, xk), s + xk

        m, s = lax.fori_loop(
            0, K, p1,
            (jnp.full((rows, TL), -jnp.inf, dtype=jnp.float32),
             jnp.zeros((rows, TL), dtype=jnp.float32)),
            unroll=True)
        avg = s * inv_k

        # ---- pass 2: accumulate exp-weights and weighted sums ----
        def p2(k, acc):
            se, sex, sd, sdx = acc
            xk = x_ref[k, rs, :].astype(jnp.float32)
            e = jnp.exp(xk - m)                            # eM (SoftPool) weight
            num = 2.0 * jnp.maximum(xk * avg, 0.0)         # Dice-Sorensen coeff
            den = jnp.maximum(xk * xk + avg * avg, tiny)
            ed = jnp.exp(num * _recip(den))                # dsc in [0,1]: no shift
            return se + e, sex + e * xk, sd + ed, sdx + ed * xk

        zero = jnp.zeros((rows, TL), dtype=jnp.float32)
        se, sex, sd, sdx = lax.fori_loop(0, K, p2, (zero, zero, zero, zero),
                                         unroll=True)

        em = sex * _recip(se)
        edscw = sdx * _recip(sd)
        out = em + beta * (edscw - em)                 # == beta*edscw + (1-beta)*em
        o_ref[rs, :] = jnp.nan_to_num(out).astype(o_ref.dtype)
        return carry

    lax.fori_loop(0, n_chunks, chunk, jnp.int32(0))


def _extract_windows(x, kernel, stride):
    """Build the (K, B*C, oD*oH*oW) window tensor (input dtype preserved).

    Exact-cover case (stride == kernel, dims divide): single reshape+transpose
    pass; otherwise K strided slices are stacked.
    TODO(synk): fold this gather into the kernel's BlockSpec / in-kernel strided
    slices to remove the extra HBM pass (biggest remaining lever on v5e/v6e).
    """
    kD, kH, kW = kernel
    sD, sH, sW = stride
    B, C, D, H, W = x.shape
    oD = (D - kD) // sD + 1
    oH = (H - kH) // sH + 1
    oW = (W - kW) // sW + 1
    K = kD * kH * kW
    if (sD, sH, sW) == (kD, kH, kW) and (D, H, W) == (oD * kD, oH * kH, oW * kW):
        xw = x.reshape(B, C, oD, kD, oH, kH, oW, kW)
        xw = xw.transpose(3, 5, 7, 0, 1, 2, 4, 6)       # (kD,kH,kW,B,C,oD,oH,oW)
    else:
        patches = []
        for id_ in range(kD):
            for ih in range(kH):
                for iw in range(kW):
                    patches.append(
                        x[:, :,
                          id_: id_ + (oD - 1) * sD + 1: sD,
                          ih: ih + (oH - 1) * sH + 1: sH,
                          iw: iw + (oW - 1) * sW + 1: sW])
        xw = jnp.stack(patches, axis=0)                  # (K,B,C,oD,oH,oW)
    return xw.reshape(K, B * C, oD * oH * oW), (oD, oH, oW)


def _fold_factor(BC, P):
    """Fold g consecutive (b, c) rows into the lane axis when P < 128.

    Free reshape (rows are contiguous); beta is just tiled g times.  Keeps at
    least 8 sublane rows where possible so sublane utilisation is not traded
    for lane utilisation.
    """
    if P >= 128 or BC <= 8:
        return 1
    best_g, best_u = 1, -1.0
    for g in range(1, BC + 1):
        if BC % g:
            continue
        rows, lanes = BC // g, g * P
        util = (min(rows, 8) / 8.0) * (lanes / float(-(-lanes // 128) * 128))
        if util > best_u + 1e-9:
            best_g, best_u = g, util
    return best_g


def _choose_tiles(BC, L, K, in_itemsize, out_itemsize):
    """Pick (TBC, TL) block dims (K-, dtype- and VMEM-budget-aware).

    TL <= 512 keeps the ~6 per-chunk f32 accumulators inside the 64-vreg file;
    TBC is then raised until the double-buffered input+output blocks reach
    ~18 MiB, amortising the ~0.35us/step pipeline overhead while staying well
    inside scoped VMEM on v5e/v6e and v7x's 64 MiB physical VMEM.
    """
    sub = max(8, 32 // max(in_itemsize, 1))       # 8 f32 / 16 bf16 / 32 int8
    TL = L if L <= 512 else 512
    budget = 18 * 1024 * 1024
    per_row = TL * (2 * K * in_itemsize + 2 * out_itemsize)
    rows_fit = max(sub, (budget // max(per_row, 1)) // sub * sub)
    rows_fit = min(rows_fit, 1024)
    TBC = BC if BC <= sub else min((BC // sub) * sub, rows_fit)
    # v7x megacore: both TensorCores need work -> avoid a (1, 1) grid.
    if TBC >= BC and TL >= L:
        if BC >= 2 * sub:
            TBC = max(sub, ((BC // 2) // sub) * sub)
        elif L >= 256 and (L // 2) % 128 == 0:
            TL = L // 2
    return TBC, TL


@functools.partial(jax.jit, static_argnames=("kernel_size", "stride"))
def adapool3d_pallas(x, beta, kernel_size=2, stride=None):
    kernel = _triple(kernel_size)
    stride = _triple(kernel_size if stride is None else stride)
    B, C, D, H, W = x.shape

    xw, (oD, oH, oW) = _extract_windows(x, kernel, stride)
    K = kernel[0] * kernel[1] * kernel[2]
    BC = B * C
    P = oD * oH * oW

    assert beta.shape in ((oD, oH, oW), (1, 1, 1)), (
        f"Required `beta` shape {(oD, oH, oW)} does not match {tuple(beta.shape)}")
    beta_flat = jnp.broadcast_to(beta.astype(jnp.float32), (oD, oH, oW)).reshape(1, P)

    # Lane-fold small P into the lane axis (free reshape; beta tiled g times).
    g = _fold_factor(BC, P)
    BC2, L = BC // g, g * P
    xw = xw.reshape(K, BC2, L)
    beta_row = jnp.tile(beta_flat, (1, g)) if g > 1 else beta_flat

    out_dtype = x.dtype
    in_sz = int(x.dtype.itemsize)
    out_sz = int(jnp.dtype(out_dtype).itemsize)

    TBC, TL = _choose_tiles(BC2, L, K, in_sz, out_sz)
    # bc is the inner (fast) grid axis so the beta tile is re-used across it.
    grid = (pl.cdiv(L, TL), pl.cdiv(BC2, TBC))

    cost = pl.CostEstimate(
        flops=int(18 * K * BC * P),
        transcendentals=int(2 * K * BC * P),
        bytes_accessed=int(K * BC * P * in_sz + BC * P * out_sz + L * 4))

    out = pl.pallas_call(
        adapool_kernel,
        out_shape=jax.ShapeDtypeStruct((BC2, L), out_dtype),
        grid=grid,
        in_specs=[
            pl.BlockSpec((K, TBC, TL), lambda j, b: (0, b, j)),
            pl.BlockSpec((1, TL), lambda j, b: (0, j)),
        ],
        out_specs=pl.BlockSpec((TBC, TL), lambda j, b: (b, j)),
        compiler_params=pltpu.CompilerParams(
            dimension_semantics=("parallel", "parallel"),
            vmem_limit_bytes=32 * 1024 * 1024),
        cost_estimate=cost,
    )(xw, beta_row)

    return out.reshape(B, C, oD, oH, oW)


def adapool3d_ref(x, beta, kernel_size=2, stride=None):
    """Plain-JAX reference (f32) for sanity checking."""
    kernel = _triple(kernel_size)
    stride = _triple(kernel_size if stride is None else stride)
    kD, kH, kW = kernel
    sD, sH, sW = stride
    B, C, D, H, W = x.shape
    oD = (D - kD) // sD + 1
    oH = (H - kH) // sH + 1
    oW = (W - kW) // sW + 1
    patches = []
    for id_ in range(kD):
        for ih in range(kH):
            for iw in range(kW):
                patches.append(
                    x[:, :,
                      id_: id_ + (oD - 1) * sD + 1: sD,
                      ih: ih + (oH - 1) * sH + 1: sH,
                      iw: iw + (oW - 1) * sW + 1: sW])
    xw = jnp.stack(patches, axis=0).astype(jnp.float32)       # (K,B,C,oD,oH,oW)
    # eM
    e = jax.nn.softmax(xw, axis=0)
    em = jnp.sum(e * xw, axis=0)
    # eDSCW
    avg = jnp.mean(xw, axis=0, keepdims=True)
    num = 2.0 * jnp.maximum(xw * avg, 0.0)
    den = jnp.maximum(xw * xw + avg * avg, jnp.finfo(jnp.float32).tiny)
    w = jax.nn.softmax(num / den, axis=0)
    edscw = jnp.sum(w * xw, axis=0)
    beta = jnp.broadcast_to(beta.astype(jnp.float32), (oD, oH, oW))
    return jnp.nan_to_num(beta * edscw + (1.0 - beta) * em)


class AdaPool3dPallas:
    """Mirrors AdaPool3d.__init__/forward (non-native path, return_mask=False)."""

    def __init__(self, kernel_size=2, beta=None, stride=None, key=None):
        self.kernel_size = _triple(kernel_size)
        self.stride = _triple(kernel_size if stride is None else stride)
        assert isinstance(beta, tuple), "beta must be a tuple (oD, oH, oW)"
        key = jax.random.PRNGKey(0) if key is None else key
        # deterministic init: randn then clamp to [0, 1] (as in AdaPool3d.__init__)
        self.beta = jnp.clip(jax.random.normal(key, beta, dtype=jnp.float32), 0.0, 1.0)

    def __call__(self, x):
        # TODO(synk): return_mask=True path (per-window soft masks) not implemented.
        return adapool3d_pallas(x, self.beta,
                                kernel_size=self.kernel_size, stride=self.stride)


def _check(x, mod, tol=None):
    out = jax.block_until_ready(mod(x))
    ref = adapool3d_ref(x, mod.beta, kernel_size=mod.kernel_size, stride=mod.stride)
    assert out.shape == ref.shape, (out.shape, ref.shape)
    assert out.dtype == x.dtype, (out.dtype, x.dtype)
    if tol is None:
        tol = 2e-2 if out.dtype == jnp.bfloat16 else 3e-3
    err = float(jnp.max(jnp.abs(out.astype(jnp.float32) - ref)))
    assert err < tol, f"max abs err {err}"
    return out


if __name__ == "__main__":
    key = jax.random.PRNGKey(0)
    k1, k2, k3, k4 = jax.random.split(key, 4)

    # Case 1: kernel_size=2 (K=8), exact-cover fast path, float32.
    x1 = jax.random.normal(k1, (2, 4, 8, 8, 8), dtype=jnp.float32)
    mod1 = AdaPool3dPallas(kernel_size=2, beta=(4, 4, 4), key=k2)
    out1 = _check(x1, mod1)
    assert out1.shape == (2, 4, 4, 4, 4)

    # Case 2: more channels -> multi-block grid over the fused B*C axis
    # (also exercises the >=2-block megacore split).
    x2 = jax.random.normal(k3, (2, 16, 16, 16, 16), dtype=jnp.float32)
    mod2 = AdaPool3dPallas(kernel_size=2, beta=(8, 8, 8), key=k4)
    _check(x2, mod2)

    # Case 3: kernel=3, stride=2 (overlapping windows -> strided-slice fallback, K=27).
    x3 = jax.random.normal(k1, (1, 2, 7, 7, 7), dtype=jnp.float32)
    mod3 = AdaPool3dPallas(kernel_size=3, stride=2, beta=(3, 3, 3), key=k2)
    _check(x3, mod3)

    # Case 4: bf16 activations stay bf16 in HBM and in the output; f32 accumulation.
    _check(x1.astype(jnp.bfloat16), mod1)

    print("KERNEL_OK")
</pallas_src>

<mosaic_0001>
module attributes {stable_mosaic.version = 11 : i64} {
  func.func @adapool_kernel(%arg0: i32, %arg1: i32, %arg2: memref<8x8x64xf32, #tpu.memory_space<vmem>>, %arg3: memref<1x64xf32, #tpu.memory_space<vmem>>, %arg4: memref<8x64xf32, #tpu.memory_space<vmem>>) attributes {dimension_semantics = [#tpu.dimension_semantics<parallel>, #tpu.dimension_semantics<parallel>], iteration_bounds = array<i64: 1, 1>, scalar_prefetch = 0 : i64, scratch_operands = 0 : i64, tpu.core_type = #tpu.core_type<tc>, window_params = [{transform_indices = @transform_0, window_bounds = array<i64: 8, 8, 64>}, {transform_indices = @transform_1, window_bounds = array<i64: 1, 64>}, {transform_indices = @transform_2, window_bounds = array<i64: 8, 64>}]} {
    %c0 = arith.constant 0 : index
    %c0_0 = arith.constant 0 : index
    %0 = vector.load %arg3[%c0, %c0_0] : memref<1x64xf32, #tpu.memory_space<vmem>>, vector<1x64xf32>
    %cst = arith.constant 1.250000e-01 : f32
    %cst_1 = arith.constant 1.17549435E-38 : f32
    %c0_i32 = arith.constant 0 : i32
    %c8_i32 = arith.constant 8 : i32
    %1 = arith.muli %c0_i32, %c8_i32 : i32
    %2 = tpu.assume_multiple %1, 8 : i32
    %cst_2 = arith.constant 0xFF800000 : f32
    %3 = vector.broadcast %cst_2 : f32 to vector<8x64xf32>
    %cst_3 = arith.constant 0.000000e+00 : f32
    %4 = vector.broadcast %cst_3 : f32 to vector<8x64xf32>
    %c0_i32_4 = arith.constant 0 : i32
    %5 = arith.index_cast %c0_i32_4 : i32 to index
    %6 = arith.index_cast %2 : i32 to index
    %c0_5 = arith.constant 0 : index
    %7 = vector.load %arg2[%5, %6, %c0_5] : memref<8x8x64xf32, #tpu.memory_space<vmem>>, vector<1x8x64xf32>
    %8 = vector.shape_cast %7 : vector<1x8x64xf32> to vector<8x64xf32>
    %9 = arith.maximumf %3, %8 : vector<8x64xf32>
    %10 = arith.addf %4, %8 : vector<8x64xf32>
    %c1_i32 = arith.constant 1 : i32
    %11 = arith.index_cast %c1_i32 : i32 to index
    %12 = arith.index_cast %2 : i32 to index
    %c0_6 = arith.constant 0 : index
    %13 = vector.load %arg2[%11, %12, %c0_6] : memref<8x8x64xf32, #tpu.memory_space<vmem>>, vector<1x8x64xf32>
    %14 = vector.shape_cast %13 : vector<1x8x64xf32> to vector<8x64xf32>
    %15 = arith.maximumf %9, %14 : vector<8x64xf32>
    %16 = arith.addf %10, %14 : vector<8x64xf32>
    %c2_i32 = arith.constant 2 : i32
    %17 = arith.index_cast %c2_i32 : i32 to index
    %18 = arith.index_cast %2 : i32 to index
    %c0_7 = arith.constant 0 : index
    %19 = vector.load %arg2[%17, %18, %c0_7] : memref<8x8x64xf32, #tpu.memory_space<vmem>>, vector<1x8x64xf32>
    %20 = vector.shape_cast %19 : vector<1x8x64xf32> to vector<8x64xf32>
    %21 = arith.maximumf %15, %20 : vector<8x64xf32>
    %22 = arith.addf %16, %20 : vector<8x64xf32>
    %c3_i32 = arith.constant 3 : i32
    %23 = arith.index_cast %c3_i32 : i32 to index
    %24 = arith.index_cast %2 : i32 to index
    %c0_8 = arith.constant 0 : index
    %25 = vector.load %arg2[%23, %24, %c0_8] : memref<8x8x64xf32, #tpu.memory_space<vmem>>, vector<1x8x64xf32>
    %26 = vector.shape_cast %25 : vector<1x8x64xf32> to vector<8x64xf32>
    %27 = arith.maximumf %21, %26 : vector<8x64xf32>
    %28 = arith.addf %22, %26 : vector<8x64xf32>
    %c4_i32 = arith.constant 4 : i32
    %29 = arith.index_cast %c4_i32 : i32 to index
    %30 = arith.index_cast %2 : i32 to index
    %c0_9 = arith.constant 0 : index
    %31 = vector.load %arg2[%29, %30, %c0_9] : memref<8x8x64xf32, #tpu.memory_space<vmem>>, vector<1x8x64xf32>
    %32 = vector.shape_cast %31 : vector<1x8x64xf32> to vector<8x64xf32>
    %33 = arith.maximumf %27, %32 : vector<8x64xf32>
    %34 = arith.addf %28, %32 : vector<8x64xf32>
    %c5_i32 = arith.constant 5 : i32
    %35 = arith.index_cast %c5_i32 : i32 to index
    %36 = arith.index_cast %2 : i32 to index
    %c0_10 = arith.constant 0 : index
    %37 = vector.load %arg2[%35, %36, %c0_10] : memref<8x8x64xf32, #tpu.memory_space<vmem>>, vector<1x8x64xf32>
    %38 = vector.shape_cast %37 : vector<1x8x64xf32> to vector<8x64xf32>
    %39 = arith.maximumf %33, %38 : vector<8x64xf32>
    %40 = arith.addf %34, %38 : vector<8x64xf32>
    %c6_i32 = arith.constant 6 : i32
    %41 = arith.index_cast %c6_i32 : i32 to index
    %42 = arith.index_cast %2 : i32 to index
    %c0_11 = arith.constant 0 : index
    %43 = vector.load %arg2[%41, %42, %c0_11] : memref<8x8x64xf32, #tpu.memory_space<vmem>>, vector<1x8x64xf32>
    %44 = vector.shape_cast %43 : vector<1x8x64xf32> to vector<8x64xf32>
    %45 = arith.maximumf %39, %44 : vector<8x64xf32>
    %46 = arith.addf %40, %44 : vector<8x64xf32>
    %c7_i32 = arith.constant 7 : i32
    %47 = arith.index_cast %c7_i32 : i32 to index
    %48 = arith.index_cast %2 : i32 to index
    %c0_12 = arith.constant 0 : index
    %49 = vector.load %arg2[%47, %48, %c0_12] : memref<8x8x64xf32, #tpu.memory_space<vmem>>, vector<1x8x64xf32>
    %50 = vector.shape_cast %49 : vector<1x8x64xf32> to vector<8x64xf32>
    %51 = arith.maximumf %45, %50 : vector<8x64xf32>
    %52 = arith.addf %46, %50 : vector<8x64xf32>
    %c8_i32_13 = arith.constant 8 : i32
    %53 = vector.broadcast %cst : f32 to vector<8x64xf32>
    %54 = arith.mulf %52, %53 : vector<8x64xf32>
    %cst_14 = arith.constant 0.000000e+00 : f32
    %55 = vector.broadcast %cst_14 : f32 to vector<8x64xf32>
    %c0_i32_15 = arith.constant 0 : i32
    %56 = arith.index_cast %c0_i32_15 : i32 to index
    %57 = arith.index_cast %2 : i32 to index
    %c0_16 = arith.constant 0 : index
    %58 = vector.load %arg2[%56, %57, %c0_16] : memref<8x8x64xf32, #tpu.memory_space<vmem>>, vector<1x8x64xf32>
    %59 = vector.shape_cast %58 : vector<1x8x64xf32> to vector<8x64xf32>
    %60 = arith.subf %59, %51 : vector<8x64xf32>
    %61 = math.exp %60 : vector<8x64xf32>
    %62 = arith.mulf %59, %54 : vector<8x64xf32>
    %cst_17 = arith.constant 0.000000e+00 : f32
    %63 = vector.broadcast %cst_17 : f32 to vector<8x64xf32>
    %64 = arith.maximumf %62, %63 : vector<8x64xf32>
    %cst_18 = arith.constant 2.000000e+00 : f32
    %65 = vector.broadcast %cst_18 : f32 to vector<8x64xf32>
    %66 = arith.mulf %65, %64 : vector<8x64xf32>
    %67 = arith.mulf %59, %59 : vector<8x64xf32>
    %68 = arith.mulf %54, %54 : vector<8x64xf32>
    %69 = arith.addf %67, %68 : vector<8x64xf32>
    %70 = vector.broadcast %cst_1 : f32 to vector<8x64xf32>
    %71 = arith.maximumf %69, %70 : vector<8x64xf32>
    %72 = tpu.reciprocal %71 {approx = true} : vector<8x64xf32> -> vector<8x64xf32>
    %73 = arith.mulf %71, %72 : vector<8x64xf32>
    %cst_19 = arith.constant 2.000000e+00 : f32
    %74 = vector.broadcast %cst_19 : f32 to vector<8x64xf32>
    %75 = arith.subf %74, %73 : vector<8x64xf32>
    %76 = arith.mulf %72, %75 : vector<8x64xf32>
    %77 = arith.mulf %66, %76 : vector<8x64xf32>
    %78 = math.exp %77 : vector<8x64xf32>
    %79 = arith.addf %55, %61 : vector<8x64xf32>
    %80 = arith.mulf %61, %59 : vector<8x64xf32>
    %81 = arith.addf %55, %80 : vector<8x64xf32>
    %82 = arith.addf %55, %78 : vector<8x64xf32>
    %83 = arith.mulf %78, %59 : vector<8x64xf32>
    %84 = arith.addf %55, %83 : vector<8x64xf32>
    %c1_i32_20 = arith.constant 1 : i32
    %85 = arith.index_cast %c1_i32_20 : i32 to index
    %86 = arith.index_cast %2 : i32 to index
    %c0_21 = arith.constant 0 : index
    %87 = vector.load %arg2[%85, %86, %c0_21] : memref<8x8x64xf32, #tpu.memory_space<vmem>>, vector<1x8x64xf32>
    %88 = vector.shape_cast %87 : vector<1x8x64xf32> to vector<8x64xf32>
    %89 = arith.subf %88, %51 : vector<8x64xf32>
    %90 = math.exp %89 : vector<8x64xf32>
    %91 = arith.mulf %88, %54 : vector<8x64xf32>
    %cst_22 = arith.constant 0.000000e+00 : f32
    %92 = vector.broadcast %cst_22 : f32 to vector<8x64xf32>
    %93 = arith.maximumf %91, %92 : vector<8x64xf32>
    %cst_23 = arith.constant 2.000000e+00 : f32
    %94 = vector.broadcast %cst_23 : f32 to vector<8x64xf32>
    %95 = arith.mulf %94, %93 : vector<8x64xf32>
    %96 = arith.mulf %88, %88 : vector<8x64xf32>
    %97 = arith.mulf %54, %54 : vector<8x64xf32>
    %98 = arith.addf %96, %97 : vector<8x64xf32>
    %99 = vector.broadcast %cst_1 : f32 to vector<8x64xf32>
    %100 = arith.maximumf %98, %99 : vector<8x64xf32>
    %101 = tpu.reciprocal %100 {approx = true} : vector<8x64xf32> -> vector<8x64xf32>
    %102 = arith.mulf %100, %101 : vector<8x64xf32>
    %cst_24 = arith.constant 2.000000e+00 : f32
    %103 = vector.broadcast %cst_24 : f32 to vector<8x64xf32>
    %104 = arith.subf %103, %102 : vector<8x64xf32>
    %105 = arith.mulf %101, %104 : vector<8x64xf32>
    %106 = arith.mulf %95, %105 : vector<8x64xf32>
    %107 = math.exp %106 : vector<8x64xf32>
    %108 = arith.addf %79, %90 : vector<8x64xf32>
    %109 = arith.mulf %90, %88 : vector<8x64xf32>
    %110 = arith.addf %81, %109 : vector<8x64xf32>
    %111 = arith.addf %82, %107 : vector<8x64xf32>
    %112 = arith.mulf %107, %88 : vector<8x64xf32>
    %113 = arith.addf %84, %112 : vector<8x64xf32>
    %c2_i32_25 = arith.constant 2 : i32
    %114 = arith.index_cast %c2_i32_25 : i32 to index
    %115 = arith.index_cast %2 : i32 to index
    %c0_26 = arith.constant 0 : index
    %116 = vector.load %arg2[%114, %115, %c0_26] : memref<8x8x64xf32, #tpu.memory_space<vmem>>, vector<1x8x64xf32>
    %117 = vector.shape_cast %116 : vector<1x8x64xf32> to vector<8x64xf32>
    %118 = arith.subf %117, %51 : vector<8x64xf32>
    %119 = math.exp %118 : vector<8x64xf32>
    %120 = arith.mulf %117, %54 : vector<8x64xf32>
    %cst_27 = arith.constant 0.000000e+00 : f32
    %121 = vector.broadcast %cst_27 : f32 to vector<8x64xf32>
    %122 = arith.maximumf %120, %121 : vector<8x64xf32>
    %cst_28 = arith.constant 2.000000e+00 : f32
    %123 = vector.broadcast %cst_28 : f32 to vector<8x64xf32>
    %124 = arith.mulf %123, %122 : vector<8x64xf32>
    %125 = arith.mulf %117, %117 : vector<8x64xf32>
    %126 = arith.mulf %54, %54 : vector<8x64xf32>
    %127 = arith.addf %125, %126 : vector<8x64xf32>
    %128 = vector.broadcast %cst_1 : f32 to vector<8x64xf32>
    %129 = arith.maximumf %127, %128 : vector<8x64xf32>
    %130 = tpu.reciprocal %129 {approx = true} : vector<8x64xf32> -> vector<8x64xf32>
    %131 = arith.mulf %129, %130 : vector<8x64xf32>
    %cst_29 = arith.constant 2.000000e+00 : f32
    %132 = vector.broadcast %cst_29 : f32 to vector<8x64xf32>
    %133 = arith.subf %132, %131 : vector<8x64xf32>
    %134 = arith.mulf %130, %133 : vector<8x64xf32>
    %135 = arith.mulf %124, %134 : vector<8x64xf32>
    %136 = math.exp %135 : vector<8x64xf32>
    %137 = arith.addf %108, %119 : vector<8x64xf32>
    %138 = arith.mulf %119, %117 : vector<8x64xf32>
    %139 = arith.addf %110, %138 : vector<8x64xf32>
    %140 = arith.addf %111, %136 : vector<8x64xf32>
    %141 = arith.mulf %136, %117 : vector<8x64xf32>
    %142 = arith.addf %113, %141 : vector<8x64xf32>
    %c3_i32_30 = arith.constant 3 : i32
    %143 = arith.index_cast %c3_i32_30 : i32 to index
    %144 = arith.index_cast %2 : i32 to index
    %c0_31 = arith.constant 0 : index
    %145 = vector.load %arg2[%143, %144, %c0_31] : memref<8x8x64xf32, #tpu.memory_space<vmem>>, vector<1x8x64xf32>
    %146 = vector.shape_cast %145 : vector<1x8x64xf32> to vector<8x64xf32>
    %147 = arith.subf %146, %51 : vector<8x64xf32>
    %148 = math.exp %147 : vector<8x64xf32>
    %149 = arith.mulf %146, %54 : vector<8x64xf32>
    %cst_32 = arith.constant 0.000000e+00 : f32
    %150 = vector.broadcast %cst_32 : f32 to vector<8x64xf32>
    %151 = arith.maximumf %149, %150 : vector<8x64xf32>
    %cst_33 = arith.constant 2.000000e+00 : f32
    %152 = vector.broadcast %cst_33 : f32 to vector<8x64xf32>
    %153 = arith.mulf %152, %151 : vector<8x64xf32>
    %154 = arith.mulf %146, %146 : vector<8x64xf32>
    %155 = arith.mulf %54, %54 : vector<8x64xf32>
    %156 = arith.addf %154, %155 : vector<8x64xf32>
    %157 = vector.broadcast %cst_1 : f32 to vector<8x64xf32>
    %158 = arith.maximumf %156, %157 : vector<8x64xf32>
    %159 = tpu.reciprocal %158 {approx = true} : vector<8x64xf32> -> vector<8x64xf32>
    %160 = arith.mulf %158, %159 : vector<8x64xf32>
    %cst_34 = arith.constant 2.000000e+00 : f32
    %161 = vector.broadcast %cst_34 : f32 to vector<8x64xf32>
    %162 = arith.subf %161, %160 : vector<8x64xf32>
    %163 = arith.mulf %159, %162 : vector<8x64xf32>
    %164 = arith.mulf %153, %163 : vector<8x64xf32>
    %165 = math.exp %164 : vector<8x64xf32>
    %166 = arith.addf %137, %148 : vector<8x64xf32>
    %167 = arith.mulf %148, %146 : vector<8x64xf32>
    %168 = arith.addf %139, %167 : vector<8x64xf32>
    %169 = arith.addf %140, %165 : vector<8x64xf32>
    %170 = arith.mulf %165, %146 : vector<8x64xf32>
    %171 = arith.addf %142, %170 : vector<8x64xf32>
    %c4_i32_35 = arith.constant 4 : i32
    %172 = arith.index_cast %c4_i32_35 : i32 to index
    %173 = arith.index_cast %2 : i32 to index
    %c0_36 = arith.constant 0 : index
    %174 = vector.load %arg2[%172, %173, %c0_36] : memref<8x8x64xf32, #tpu.memory_space<vmem>>, vector<1x8x64xf32>
    %175 = vector.shape_cast %174 : vector<1x8x64xf32> to vector<8x64xf32>
    %176 = arith.subf %175, %51 : vector<8x64xf32>
    %177 = math.exp %176 : vector<8x64xf32>
    %178 = arith.mulf %175, %54 : vector<8x64xf32>
    %cst_37 = arith.constant 0.000000e+00 : f32
    %179 = vector.broadcast %cst_37 : f32 to vector<8x64xf32>
    %180 = arith.maximumf %178, %179 : vector<8x64xf32>
    %cst_38 = arith.constant 2.000000e+00 : f32
    %181 = vector.broadcast %cst_38 : f32 to vector<8x64xf32>
    %182 = arith.mulf %181, %180 : vector<8x64xf32>
    %183 = arith.mulf %175, %175 : vector<8x64xf32>
    %184 = arith.mulf %54, %54 : vector<8x64xf32>
    %185 = arith.addf %183, %184 : vector<8x64xf32>
    %186 = vector.broadcast %cst_1 : f32 to vector<8x64xf32>
    %187 = arith.maximumf %185, %186 : vector<8x64xf32>
    %188 = tpu.reciprocal %187 {approx = true} : vector<8x64xf32> -> vector<8x64xf32>
    %189 = arith.mulf %187, %188 : vector<8x64xf32>
    %cst_39 = arith.constant 2.000000e+00 : f32
    %190 = vector.broadcast %cst_39 : f32 to vector<8x64xf32>
    %191 = arith.subf %190, %189 : vector<8x64xf32>
    %192 = arith.mulf %188, %191 : vector<8x64xf32>
    %193 = arith.mulf %182, %192 : vector<8x64xf32>
    %194 = math.exp %193 : vector<8x64xf32>
    %195 = arith.addf %166, %177 : vector<8x64xf32>
    %196 = arith.mulf %177, %175 : vector<8x64xf32>
    %197 = arith.addf %168, %196 : vector<8x64xf32>
    %198 = arith.addf %169, %194 : vector<8x64xf32>
    %199 = arith.mulf %194, %175 : vector<8x64xf32>
    %200 = arith.addf %171, %199 : vector<8x64xf32>
    %c5_i32_40 = arith.constant 5 : i32
    %201 = arith.index_cast %c5_i32_40 : i32 to index
    %202 = arith.index_cast %2 : i32 to index
    %c0_41 = arith.constant 0 : index
    %203 = vector.load %arg2[%201, %202, %c0_41] : memref<8x8x64xf32, #tpu.memory_space<vmem>>, vector<1x8x64xf32>
    %204 = vector.shape_cast %203 : vector<1x8x64xf32> to vector<8x64xf32>
    %205 = arith.subf %204, %51 : vector<8x64xf32>
    %206 = math.exp %205 : vector<8x64xf32>
    %207 = arith.mulf %204, %54 : vector<8x64xf32>
    %cst_42 = arith.constant 0.000000e+00 : f32
    %208 = vector.broadcast %cst_42 : f32 to vector<8x64xf32>
    %209 = arith.maximumf %207, %208 : vector<8x64xf32>
    %cst_43 = arith.constant 2.000000e+00 : f32
    %210 = vector.broadcast %cst_43 : f32 to vector<8x64xf32>
    %211 = arith.mulf %210, %209 : vector<8x64xf32>
    %212 = arith.mulf %204, %204 : vector<8x64xf32>
    %213 = arith.mulf %54, %54 : vector<8x64xf32>
    %214 = arith.addf %212, %213 : vector<8x64xf32>
    %215 = vector.broadcast %cst_1 : f32 to vector<8x64xf32>
    %216 = arith.maximumf %214, %215 : vector<8x64xf32>
    %217 = tpu.reciprocal %216 {approx = true} : vector<8x64xf32> -> vector<8x64xf32>
    %218 = arith.mulf %216, %217 : vector<8x64xf32>
    %cst_44 = arith.constant 2.000000e+00 : f32
    %219 = vector.broadcast %cst_44 : f32 to vector<8x64xf32>
    %220 = arith.subf %219, %218 : vector<8x64xf32>
    %221 = arith.mulf %217, %220 : vector<8x64xf32>
    %222 = arith.mulf %211, %221 : vector<8x64xf32>
    %223 = math.exp %222 : vector<8x64xf32>
    %224 = arith.addf %195, %206 : vector<8x64xf32>
    %225 = arith.mulf %206, %204 : vector<8x64xf32>
    %226 = arith.addf %197, %225 : vector<8x64xf32>
    %227 = arith.addf %198, %223 : vector<8x64xf32>
    %228 = arith.mulf %223, %204 : vector<8x64xf32>
    %229 = arith.addf %200, %228 : vector<8x64xf32>
    %c6_i32_45 = arith.constant 6 : i32
    %230 = arith.index_cast %c6_i32_45 : i32 to index
    %231 = arith.index_cast %2 : i32 to index
    %c0_46 = arith.constant 0 : index
    %232 = vector.load %arg2[%230, %231, %c0_46] : memref<8x8x64xf32, #tpu.memory_space<vmem>>, vector<1x8x64xf32>
    %233 = vector.shape_cast %232 : vector<1x8x64xf32> to vector<8x64xf32>
    %234 = arith.subf %233, %51 : vector<8x64xf32>
    %235 = math.exp %234 : vector<8x64xf32>
    %236 = arith.mulf %233, %54 : vector<8x64xf32>
    %cst_47 = arith.constant 0.000000e+00 : f32
    %237 = vector.broadcast %cst_47 : f32 to vector<8x64xf32>
    %238 = arith.maximumf %236, %237 : vector<8x64xf32>
    %cst_48 = arith.constant 2.000000e+00 : f32
    %239 = vector.broadcast %cst_48 : f32 to vector<8x64xf32>
    %240 = arith.mulf %239, %238 : vector<8x64xf32>
    %241 = arith.mulf %233, %233 : vector<8x64xf32>
    %242 = arith.mulf %54, %54 : vector<8x64xf32>
    %243 = arith.addf %241, %242 : vector<8x64xf32>
    %244 = vector.broadcast %cst_1 : f32 to vector<8x64xf32>
    %245 = arith.maximumf %243, %244 : vector<8x64xf32>
    %246 = tpu.reciprocal %245 {approx = true} : vector<8x64xf32> -> vector<8x64xf32>
    %247 = arith.mulf %245, %246 : vector<8x64xf32>
    %cst_49 = arith.constant 2.000000e+00 : f32
    %248 = vector.broadcast %cst_49 : f32 to vector<8x64xf32>
    %249 = arith.subf %248, %247 : vector<8x64xf32>
    %250 = arith.mulf %246, %249 : vector<8x64xf32>
    %251 = arith.mulf %240, %250 : vector<8x64xf32>
    %252 = math.exp %251 : vector<8x64xf32>
    %253 = arith.addf %224, %235 : vector<8x64xf32>
    %254 = arith.mulf %235, %233 : vector<8x64xf32>
    %255 = arith.addf %226, %254 : vector<8x64xf32>
    %256 = arith.addf %227, %252 : vector<8x64xf32>
    %257 = arith.mulf %252, %233 : vector<8x64xf32>
    %258 = arith.addf %229, %257 : vector<8x64xf32>
    %c7_i32_50 = arith.constant 7 : i32
    %259 = arith.index_cast %c7_i32_50 : i32 to index
    %260 = arith.index_cast %2 : i32 to index
    %c0_51 = arith.constant 0 : index
    %261 = vector.load %arg2[%259, %260, %c0_51] : memref<8x8x64xf32, #tpu.memory_space<vmem>>, vector<1x8x64xf32>
    %262 = vector.shape_cast %261 : vector<1x8x64xf32> to vector<8x64xf32>
    %263 = arith.subf %262, %51 : vector<8x64xf32>
    %264 = math.exp %263 : vector<8x64xf32>
    %265 = arith.mulf %262, %54 : vector<8x64xf32>
    %cst_52 = arith.constant 0.000000e+00 : f32
    %266 = vector.broadcast %cst_52 : f32 to vector<8x64xf32>
    %267 = arith.maximumf %265, %266 : vector<8x64xf32>
    %cst_53 = arith.constant 2.000000e+00 : f32
    %268 = vector.broadcast %cst_53 : f32 to vector<8x64xf32>
    %269 = arith.mulf %268, %267 : vector<8x64xf32>
    %270 = arith.mulf %262, %262 : vector<8x64xf32>
    %271 = arith.mulf %54, %54 : vector<8x64xf32>
    %272 = arith.addf %270, %271 : vector<8x64xf32>
    %273 = vector.broadcast %cst_1 : f32 to vector<8x64xf32>
    %274 = arith.maximumf %272, %273 : vector<8x64xf32>
    %275 = tpu.reciprocal %274 {approx = true} : vector<8x64xf32> -> vector<8x64xf32>
    %276 = arith.mulf %274, %275 : vector<8x64xf32>
    %cst_54 = arith.constant 2.000000e+00 : f32
    %277 = vector.broadcast %cst_54 : f32 to vector<8x64xf32>
    %278 = arith.subf %277, %276 : vector<8x64xf32>
    %279 = arith.mulf %275, %278 : vector<8x64xf32>
    %280 = arith.mulf %269, %279 : vector<8x64xf32>
    %281 = math.exp %280 : vector<8x64xf32>
    %282 = arith.addf %253, %264 : vector<8x64xf32>
    %283 = arith.mulf %264, %262 : vector<8x64xf32>
    %284 = arith.addf %255, %283 : vector<8x64xf32>
    %285 = arith.addf %256, %281 : vector<8x64xf32>
    %286 = arith.mulf %281, %262 : vector<8x64xf32>
    %287 = arith.addf %258, %286 : vector<8x64xf32>
    %c8_i32_55 = arith.constant 8 : i32
    %288 = tpu.reciprocal %282 {approx = true} : vector<8x64xf32> -> vector<8x64xf32>
    %289 = arith.mulf %282, %288 : vector<8x64xf32>
    %cst_56 = arith.constant 2.000000e+00 : f32
    %290 = vector.broadcast %cst_56 : f32 to vector<8x64xf32>
    %291 = arith.subf %290, %289 : vector<8x64xf32>
    %292 = arith.mulf %288, %291 : vector<8x64xf32>
    %293 = arith.mulf %284, %292 : vector<8x64xf32>
    %294 = tpu.reciprocal %285 {approx = true} : vector<8x64xf32> -> vector<8x64xf32>
    %295 = arith.mulf %285, %294 : vector<8x64xf32>
    %cst_57 = arith.constant 2.000000e+00 : f32
    %296 = vector.broadcast %cst_57 : f32 to vector<8x64xf32>
    %297 = arith.subf %296, %295 : vector<8x64xf32>
    %298 = arith.mulf %294, %297 : vector<8x64xf32>
    %299 = arith.mulf %287, %298 : vector<8x64xf32>
    %300 = arith.subf %299, %293 : vector<8x64xf32>
    %301 = vector.broadcast %0 : vector<1x64xf32> to vector<8x64xf32>
    %302 = arith.mulf %301, %300 : vector<8x64xf32>
    %303 = arith.addf %293, %302 : vector<8x64xf32>
    %304 = arith.cmpf one, %303, %303 : vector<8x64xf32>
    %cst_58 = arith.constant 0.000000e+00 : f32
    %305 = vector.broadcast %cst_58 : f32 to vector<8x64xf32>
    %306 = arith.select %304, %305, %303 : vector<8x64xi1>, vector<8x64xf32>
    %cst_59 = arith.constant 0x7F800000 : f32
    %307 = vector.broadcast %cst_59 : f32 to vector<8x64xf32>
    %308 = arith.cmpf oeq, %306, %307 : vector<8x64xf32>
    %cst_60 = arith.constant 3.40282347E+38 : f32
    %309 = vector.broadcast %cst_60 : f32 to vector<8x64xf32>
    %310 = arith.select %308, %309, %306 : vector<8x64xi1>, vector<8x64xf32>
    %cst_61 = arith.constant 0xFF800000 : f32
    %311 = vector.broadcast %cst_61 : f32 to vector<8x64xf32>
    %312 = arith.cmpf oeq, %310, %311 : vector<8x64xf32>
    %cst_62 = arith.constant -3.40282347E+38 : f32
    %313 = vector.broadcast %cst_62 : f32 to vector<8x64xf32>
    %314 = arith.select %312, %313, %310 : vector<8x64xi1>, vector<8x64xf32>
    %315 = arith.index_cast %2 : i32 to index
    %c0_63 = arith.constant 0 : index
    %316 = vector.load %arg4[%315, %c0_63] : memref<8x64xf32, #tpu.memory_space<vmem>>, vector<8x64xf32>
    tpu.vector_store %arg4[%315, %c0_63], %314 {strides = array<i32>} : memref<8x64xf32, #tpu.memory_space<vmem>>, vector<8x64xf32>,
    %c1_i32_64 = arith.constant 1 : i32
    return
  }
  func.func @transform_0(%arg0: i32, %arg1: i32) -> (i32, i32, i32) {
    %c0_i32 = arith.constant 0 : i32
    %c0_i32_0 = arith.constant 0 : i32
    return %c0_i32, %arg1, %arg0 : i32, i32, i32
  }
  func.func @transform_1(%arg0: i32, %arg1: i32) -> (i32, i32) {
    %c0_i32 = arith.constant 0 : i32
    %c0_i32_0 = arith.constant 0 : i32
    return %c0_i32, %arg0 : i32, i32
  }
  func.func @transform_2(%arg0: i32, %arg1: i32) -> (i32, i32) {
    %c0_i32 = arith.constant 0 : i32
    return %arg1, %arg0 : i32, i32
  }
}

</mosaic_0001>

<bundles_post_ra>
// kernel: adapool3d_pallas.1
= control target key start
LH: loop header
LB: loop body
LE: loop exit
PB: predicated region body
PF: predicated region fallthrough
CT: control target
= control target key end

     0   :  { %vm252_vm2 = vcmask 523264   ;;  %s527_s0 = inlined_call_operand.vmem [shape: f32[8,8,64], index: 0, kind: input, shape index: {}]   ;;  %s528_s1 = inlined_call_operand.vmem [shape: f32[1,64], index: 1, kind: input, shape index: {}]   ;;  %s529_s2 = inlined_call_operand.vmem [shape: f32[8,64], index: 2, kind: output, shape index: {}]  }
   0x1   :  { %v343_v0 = vld [vmem:[%s527_s0] sm:$0xff]  ;;  %v348_v1 = vld [vmem:[%s527_s0 + $0x8] sm:$0xff]  ;;  %v357_v4 = vld [vmem:[%s527_s0 + $0x10] sm:$0xff] }
   0x2   :  { %v17_v2 = vmax.f32 %v343_v0, %v348_v1  ;;  %v18_v3 = vadd.f32 %v348_v1, %v343_v0  ;;  %v362_v5 = vld [vmem:[%s527_s0 + $0x18] sm:$0xff]  ;;  %v369_v8 = vld [vmem:[%s527_s0 + $0x20] sm:$0xff]  ;;  %v376_v11 = vld [vmem:[%s527_s0 + $0x28] sm:$0xff]  ;;  %v56_v22 = vmul.f32 %v343_v0, %v343_v0  ;;  %v79_v23 = vmul.f32 %v348_v1, %v348_v1 }
   0x3   :  { %v383_v14 = vld [vmem:[%s527_s0 + $0x30] sm:$0xff]  ;;  %v390_v17 = vld [vmem:[%s527_s0 + $0x38] sm:$0xff]  ;;  %v101_v28 = vmul.f32 %v357_v4, %v357_v4  ;;  %v123_v35 = vmul.f32 %v362_v5, %v362_v5  ;;  %v145_v40 = vmul.f32 %v369_v8, %v369_v8  ;;  %v167_v44 = vmul.f32 %v376_v11, %v376_v11 }
   0x4   :  { %v22_v6 = vmax.f32 %v17_v2, %v357_v4  ;;  %v23_v7 = vadd.f32 %v357_v4, %v18_v3  ;;  %v189_v48 = vmul.f32 %v383_v14, %v383_v14  ;;  %v211_v51 = vmul.f32 %v390_v17, %v390_v17 }
   0x6   :  { %v27_v9 = vmax.f32 %v22_v6, %v362_v5  ;;  %v28_v10 = vadd.f32 %v362_v5, %v23_v7 }
   0x8   :  { %v32_v12 = vmax.f32 %v27_v9, %v369_v8  ;;  %v33_v13 = vadd.f32 %v369_v8, %v28_v10 }
   0xa   :  { %v37_v15 = vmax.f32 %v32_v12, %v376_v11  ;;  %v38_v16 = vadd.f32 %v376_v11, %v33_v13 }
   0xc   :  { %v42_v18 = vmax.f32 %v37_v15, %v383_v14  ;;  %v43_v19 = vadd.f32 %v383_v14, %v38_v16 }
   0xe   :  { %v395_v20 = vmax.f32 %v42_v18, %v390_v17  ;;  %v48_v21 = vadd.f32 %v390_v17, %v43_v19 }
  0x10   :  { %v402_v24 = vmul.f32 0.125, %v48_v21  ;;  %v50_v25 = vsub.f32 %v343_v0, %v395_v20  ;;  %v73_v26 = vsub.f32 %v348_v1, %v395_v20  ;;  %v95_v27 = vsub.f32 %v357_v4, %v395_v20 }
  0x11   :  { %v117_v29 = vsub.f32 %v362_v5, %v395_v20  ;;  %v139_v38 = vsub.f32 %v369_v8, %v395_v20  ;;  %v161_v59 = vsub.f32 %v376_v11, %v395_v20  ;;  %v183_v10 = vsub.f32 %v383_v14, %v395_v20 }
  0x12   :  { %v51_v30 = vmul.f32 1.442695, %v50_v25  ;;  %v57_v31 = vmul.f32 %v402_v24, %v402_v24  ;;  %v74_v32 = vmul.f32 1.442695, %v73_v26  ;;  %v96_v33 = vmul.f32 1.442695, %v95_v27 }
  0x13   :  { %v118_v34 = vmul.f32 1.442695, %v117_v29  ;;  %v140_v46 = vmul.f32 1.442695, %v139_v38  ;;  %v53_v49 = vmul.f32 %v402_v24, %v343_v0  ;;  %v76_v52 = vmul.f32 %v348_v1, %v402_v24 }
  0x14   :  { %273 = vpow2.f32 %v51_v30  ;;  %v418_v36 = vadd.f32 %v57_v31, %v56_v22  ;;  %v420_v37 = vadd.f32 %v79_v23, %v57_v31  ;;  %v424_v39 = vadd.f32 %v101_v28, %v57_v31 }
  0x15   :  { %275 = vpow2.f32 %v74_v32  ;;  %v433_v45 = vadd.f32 %v123_v35, %v57_v31  ;;  %v437_v47 = vadd.f32 %v145_v40, %v57_v31  ;;  %v451_v54 = vadd.f32 %v167_v44, %v57_v31 }
  0x16   :  { %v59_v41 = vmax.f32 %v418_v36, 1.1754944e-38  ;;  %v81_v42 = vmax.f32 %v420_v37, 1.1754944e-38  ;;  %277 = vpow2.f32 %v96_v33  ;;  %v103_v43 = vmax.f32 %v424_v39, 1.1754944e-38 }
  0x17   :  { %279 = vpow2.f32 %v118_v34  ;;  %v125_v50 = vmax.f32 %v433_v45, 1.1754944e-38  ;;  %v147_v53 = vmax.f32 %v437_v47, 1.1754944e-38  ;;  %v98_v55 = vmul.f32 %v357_v4, %v402_v24 }
  0x18   :  { %281 = vrcp.f32 %v59_v41  ;;  %v120_v56 = vmul.f32 %v362_v5, %v402_v24  ;;  %v169_v57 = vmax.f32 %v451_v54, 1.1754944e-38  ;;  %v142_v58 = vmul.f32 %v369_v8, %v402_v24 }
  0x19   :  { %283 = vrcp.f32 %v81_v42  ;;  %v466_v60 = vadd.f32 %v189_v48, %v57_v31  ;;  %v54_v61 = vmax.f32 %v53_v49, 0.0  ;;  %v77_v62 = vmax.f32 %v76_v52, 0.0 }
  0x1a   :  { %285 = vrcp.f32 %v103_v43  ;;  %v470_v63 = vadd.f32 %v211_v51, %v57_v31  ;;  %v99_v2 = vmax.f32 %v98_v55, 0.0  ;;  %v164_v3 = vmul.f32 %v376_v11, %v402_v24 }
  0x1b   :  { %287 = vpow2.f32 %v140_v46  ;;  %v191_v6 = vmax.f32 %v466_v60, 1.1754944e-38  ;;  %v121_v9 = vmax.f32 %v120_v56, 0.0  ;;  %v143_v16 = vmax.f32 %v142_v58, 0.0 }
  0x1c   :  { %289 = vrcp.f32 %v125_v50  ;;  %v213_v12 = vmax.f32 %v470_v63, 1.1754944e-38  ;;  %v55_v19 = vmul.f32 2.0, %v54_v61  ;;  %v78_v21 = vmul.f32 2.0, %v77_v62 }
  0x1d   :  { %291 = vrcp.f32 %v147_v53  ;;  %v162_v23 = vmul.f32 1.442695, %v161_v59  ;;  %v100_v26 = vmul.f32 2.0, %v99_v2  ;;  %v165_v28 = vmax.f32 %v164_v3, 0.0 }
  0x1e   :  { %293 = vrcp.f32 %v169_v57  ;;  %v122_v31 = vmul.f32 2.0, %v121_v9  ;;  %v184_v33 = vmul.f32 1.442695, %v183_v10  ;;  %v144_v36 = vmul.f32 2.0, %v143_v16 }
  0x1f   :  { %295 = vrcp.f32 %v191_v6  ;;  %v186_v38 = vmul.f32 %v383_v14, %v402_v24  ;;  %v205_v40 = vsub.f32 %v390_v17, %v395_v20  ;;  %v208_v56 = vmul.f32 %v390_v17, %v402_v24 }
  0x20   :  { %297 = vrcp.f32 %v213_v12 }
  0x21   :  { %v274_v7 = vpop.eup %273  ;;  %299 = vpow2.f32 %v162_v23  ;;  %v206_v3 = vmul.f32 1.442695, %v205_v40  ;;  %v187_v16 = vmax.f32 %v186_v38, 0.0  ;;  %v209_v45 = vmax.f32 %v208_v56, 0.0 }
  0x22   :  { %v276_v13 = vpop.eup %275  ;;  %v68_v15 = vmul.f32 %v274_v7, %v343_v0  ;;  %301 = vpow2.f32 %v184_v33 }
  0x23   :  { %v278_v18 = vpop.eup %277  ;;  %v90_v22 = vmul.f32 %v276_v13, %v348_v1  ;;  %v89_v48 = vadd.f32 %v276_v13, %v274_v7  ;;  %303 = vpow2.f32 %v206_v3 }
  0x24   :  { %v280_v25 = vpop.eup %279  ;;  %v112_v27 = vmul.f32 %v278_v18, %v357_v4 }
  0x25   :  { %v282_v29 = vpop.eup %281  ;;  %v91_v30 = vadd.f32 %v90_v22, %v68_v15  ;;  %v134_v32 = vmul.f32 %v280_v25, %v362_v5  ;;  %v111_v39 = vadd.f32 %v278_v18, %v89_v48 }
  0x26   :  { %v284_v34 = vpop.eup %283  ;;  %v61_v35 = vmul.f32 %v282_v29, %v59_v41  ;;  %v166_v41 = vmul.f32 2.0, %v165_v28 }
  0x27   :  { %v286_v44 = vpop.eup %285  ;;  %v83_v46 = vmul.f32 %v284_v34, %v81_v42  ;;  %v113_v49 = vadd.f32 %v112_v27, %v91_v30 }
  0x28   :  { %v288_v51 = vpop.eup %287  ;;  %v62_v52 = vsub.f32 2.0, %v61_v35  ;;  %v105_v55 = vmul.f32 %v286_v44, %v103_v43  ;;  %v188_v35 = vmul.f32 2.0, %v187_v16 }
  0x29   :  { %v290_v58 = vpop.eup %289  ;;  %v84_v59 = vsub.f32 2.0, %v83_v46  ;;  %v135_v61 = vadd.f32 %v134_v32, %v113_v49  ;;  %v156_v20 = vmul.f32 %v288_v51, %v369_v8  ;;  %v210_v49 = vmul.f32 2.0, %v209_v45 }
  0x2a   :  { %v292_v37 = vpop.eup %291  ;;  %v63_v42 = vmul.f32 %v282_v29, %v62_v52  ;;  %v106_v62 = vsub.f32 2.0, %v105_v55  ;;  %v127_v2 = vmul.f32 %v290_v58, %v125_v50 }
  0x2b   :  { %v85_v7 = vmul.f32 %v284_v34, %v84_v59  ;;  %v149_v43 = vmul.f32 %v292_v37, %v147_v53  ;;  %v501_v9 = vadd.f32 %v156_v20, %v135_v61  ;;  %v294_v24 = vpop.eup %293  ;;  %v133_v53 = vadd.f32 %v280_v25, %v111_v39 }
  0x2c   :  { %v64_v10 = vmul.f32 %v63_v42, %v55_v19  ;;  %v107_v13 = vmul.f32 %v286_v44, %v106_v62  ;;  %v128_v15 = vsub.f32 2.0, %v127_v2  ;;  %v171_v27 = vmul.f32 %v294_v24, %v169_v57  ;;  %v296_v18 = vpop.eup %295 }
  0x2d   :  { %v86_v22 = vmul.f32 %v85_v7, %v78_v21  ;;  %v150_v23 = vsub.f32 2.0, %v149_v43  ;;  %v193_v21 = vmul.f32 %v296_v18, %v191_v6  ;;  %v298_v34 = vpop.eup %297  ;;  %v155_v44 = vadd.f32 %v288_v51, %v133_v53 }
  0x2e   :  { %v65_v50 = vmul.f32 1.442695, %v64_v10  ;;  %v108_v28 = vmul.f32 %v107_v13, %v100_v26  ;;  %v129_v29 = vmul.f32 %v290_v58, %v128_v15  ;;  %v172_v32 = vsub.f32 2.0, %v171_v27  ;;  %v300_v48 = vpop.eup %299 }
  0x2f   :  { %v87_v47 = vmul.f32 1.442695, %v86_v22  ;;  %v151_v30 = vmul.f32 %v292_v37, %v150_v23  ;;  %v194_v38 = vsub.f32 2.0, %v193_v21  ;;  %v215_v40 = vmul.f32 %v298_v34, %v213_v12  ;;  %v302_v52 = vpop.eup %301 }
  0x30   :  { %305 = vpow2.f32 %v65_v50  ;;  %v109_v19 = vmul.f32 1.442695, %v108_v28  ;;  %v130_v33 = vmul.f32 %v129_v29, %v122_v31  ;;  %v173_v57 = vmul.f32 %v294_v24, %v172_v32  ;;  %v304_v12 = vpop.eup %303 }
  0x31   :  { %307 = vpow2.f32 %v87_v47  ;;  %v152_v54 = vmul.f32 %v151_v30, %v144_v36  ;;  %v195_v31 = vmul.f32 %v296_v18, %v194_v38  ;;  %v216_v60 = vsub.f32 2.0, %v215_v40 }
  0x32   :  { %309 = vpow2.f32 %v109_v19  ;;  %v131_v26 = vmul.f32 1.442695, %v130_v33  ;;  %v174_v46 = vmul.f32 %v173_v57, %v166_v41  ;;  %v177_v56 = vadd.f32 %v300_v48, %v155_v44 }
  0x33   :  { %v153_v25 = vmul.f32 1.442695, %v152_v54  ;;  %v196_v36 = vmul.f32 %v195_v31, %v188_v35  ;;  %v217_v55 = vmul.f32 %v298_v34, %v216_v60  ;;  %v178_v29 = vmul.f32 %v300_v48, %v376_v11 }
  0x34   :  { %311 = vpow2.f32 %v131_v26  ;;  %v175_v6 = vmul.f32 1.442695, %v174_v46  ;;  %v199_v61 = vadd.f32 %v302_v52, %v177_v56  ;;  %v222_v33 = vmul.f32 %v304_v12, %v390_v17 }
  0x35   :  { %313 = vpow2.f32 %v153_v25  ;;  %v197_v58 = vmul.f32 1.442695, %v196_v36  ;;  %v218_v59 = vmul.f32 %v217_v55, %v210_v49  ;;  %v179_v47 = vadd.f32 %v178_v29, %v501_v9 }
  0x36   :  { %315 = vpow2.f32 %v175_v6  ;;  %v221_v2 = vadd.f32 %v304_v12, %v199_v61 }
  0x37   :  { %317 = vpow2.f32 %v197_v58  ;;  %v219_v63 = vmul.f32 1.442695, %v218_v59 }
  0x39   :  { %319 = vpow2.f32 %v219_v63 }
  0x3a   :  { %321 = vrcp.f32 %v221_v2 }
  0x3d   :  { %v306_v51 = vpop.eup %305 }
  0x3e   :  { %v308_v41 = vpop.eup %307  ;;  %v71_v20 = vmul.f32 %v306_v51, %v343_v0 }
  0x3f   :  { %v310_v37 = vpop.eup %309  ;;  %v92_v42 = vadd.f32 %v308_v41, %v306_v51  ;;  %v93_v62 = vmul.f32 %v308_v41, %v348_v1 }
  0x40   :  { %v115_v3 = vmul.f32 %v310_v37, %v357_v4 }
  0x41   :  { %v312_v7 = vpop.eup %311  ;;  %v94_v39 = vadd.f32 %v93_v62, %v71_v20  ;;  %v114_v43 = vadd.f32 %v310_v37, %v92_v42 }
  0x42   :  { %v314_v24 = vpop.eup %313  ;;  %v137_v10 = vmul.f32 %v312_v7, %v362_v5 }
  0x43   :  { %v116_v13 = vadd.f32 %v115_v3, %v94_v39  ;;  %v136_v15 = vadd.f32 %v312_v7, %v114_v43  ;;  %v159_v16 = vmul.f32 %v314_v24, %v369_v8  ;;  %v316_v22 = vpop.eup %315  ;;  %v200_v8 = vmul.f32 %v302_v52, %v383_v14 }
  0x44   :  { %v318_v27 = vpop.eup %317  ;;  %v181_v5 = vmul.f32 %v316_v22, %v376_v11 }
  0x45   :  { %v138_v0 = vadd.f32 %v137_v10, %v116_v13  ;;  %v158_v23 = vadd.f32 %v314_v24, %v136_v15  ;;  %v203_v32 = vmul.f32 %v318_v27, %v383_v14  ;;  %v201_v19 = vadd.f32 %v200_v8, %v179_v47  ;;  %v272_v14 = vld [vmem:[%s528_s1] ss:$0 sm:$0xff] }
  0x46   :  { %v320_v50 = vpop.eup %319 }
  0x47   :  { %v160_v45 = vadd.f32 %v159_v16, %v138_v0  ;;  %v180_v1 = vadd.f32 %v316_v22, %v158_v23  ;;  %v322_v18 = vpop.eup %321  ;;  %v225_v54 = vmul.f32 %v320_v50, %v390_v17  ;;  %v223_v35 = vadd.f32 %v222_v33, %v201_v19 }
  0x48   :  { %v228_v53 = vmul.f32 %v322_v18, %v221_v2 }
  0x49   :  { %v202_v28 = vadd.f32 %v318_v27, %v180_v1  ;;  %v182_v30 = vadd.f32 %v181_v5, %v160_v45 }
  0x4a   :  { %v229_v21 = vsub.f32 2.0, %v228_v53 }
  0x4b   :  { %v224_v4 = vadd.f32 %v320_v50, %v202_v28  ;;  %v204_v34 = vadd.f32 %v203_v32, %v182_v30 }
  0x4c   :  { %v230_v26 = vmul.f32 %v322_v18, %v229_v21 }
  0x4d   :  { %323 = vrcp.f32 %v224_v4  ;;  %v226_v11 = vadd.f32 %v225_v54, %v204_v34 }
  0x4e   :  { %v231_v9 = vmul.f32 %v230_v26, %v223_v35 }
  0x5a   :  { %v324_v57 = vpop.eup %323 }
  0x5b   :  { %v233_v38 = vmul.f32 %v324_v57, %v224_v4 }
  0x5d   :  { %v234_v40 = vsub.f32 2.0, %v233_v38 }
  0x5f   :  { %v235_v25 = vmul.f32 %v324_v57, %v234_v40 }
  0x61   :  { %v236_v44 = vmul.f32 %v235_v25, %v226_v11 }
  0x63   :  { %v237_v46 = vsub.f32 %v236_v44, %v231_v9 }
  0x65   :  { %v244_v48 = vmul.f32 %v272_v14, %v237_v46 }
  0x67   :  { %v245_v31 = vadd.f32 %v244_v48, %v231_v9 }
  0x69   :  { %vm246_vm0 = vcmp.ne.f32.partialorder %v245_v31, %v245_v31 }
  0x6a   :  { %v247_v49 = vsel %vm246_vm0, 0.0, %v245_v31 }
  0x6b   :  { %vm248_vm1 = vcmp.eq.f32.partialorder %v247_v49, inf }
  0x6c   :  { %v249_v17 = vsel %vm248_vm1, 3.4028235e+38, %v247_v49 }
  0x6d   :  { %vm250_vm3 = vcmp.eq.f32.partialorder %v249_v17, -inf }
  0x6e   :  { %v251_v60 = vsel %vm250_vm3, -3.4028235e+38, %v249_v17 }
  0x6f   :  { %253 = vst.msk [vmem:[%s529_s2] sm:$0xff] %vm252_vm2, %v251_v60 }

</bundles_post_ra>
